<compile_context>
chip_gen: v7x
topology: tpu7x:2x2x1
jax: 0.10.0
libtpu: 0.0.40
codegen_flags: <defaults>
</compile_context>

<pallas_src>
import jax
import jax.numpy as jnp
from jax import lax
from jax.experimental import pallas as pl
from jax.experimental.pallas import tpu as pltpu


def _round_up(x, m):
    return ((x + m - 1) // m) * m


def _textcls_kernel(tok_ref, bid_ref, inv_ref, emb_ref, w_ref, b_ref,
                    out_ref, acc_ref):
    i = pl.program_id(0)          # bag-tile index (parallel)
    j = pl.program_id(1)          # token-tile index (reduction)

    TB, _ = acc_ref.shape
    TT = tok_ref.shape[0]
    V_pad = emb_ref.shape[0]

    @pl.when(j == 0)
    def _():
        acc_ref[...] = jnp.zeros_like(acc_ref)

    # ---- EmbeddingBag gather as an MXU matmul --------------------------------
    # one_hot[t, v] = (tokens[t] == v)                      -> (TT, V_pad)
    toks = tok_ref[...]                                     # (TT, 1) int32
    vocab_iota = lax.broadcasted_iota(jnp.int32, (TT, V_pad), 1)
    one_hot = (vocab_iota == toks).astype(jnp.float32)
    tok_embs = jnp.dot(one_hot, emb_ref[...],
                       preferred_element_type=jnp.float32)  # (TT, D_pad)

    # ---- Segment-sum token embeddings into their bags (second MXU matmul) ----
    # seg[b, t] = (bag_id[t] == i*TB + b); padded tokens carry bag_id = -1.
    bids = bid_ref[...]                                     # (1, TT) int32
    bag_iota = lax.broadcasted_iota(jnp.int32, (TB, TT), 0) + i * TB
    seg = (bids == bag_iota).astype(jnp.float32)            # (TB, TT)
    acc_ref[...] += jnp.dot(seg, tok_embs,
                            preferred_element_type=jnp.float32)

    # ---- Finalize once per bag tile: mean + Linear ----------------------------
    @pl.when(j == pl.num_programs(1) - 1)
    def _():
        means = acc_ref[...] * inv_ref[...]                 # (TB, D_pad) * (TB, 1)
        logits = jnp.dot(means, w_ref[...],
                         preferred_element_type=jnp.float32)  # (TB, C_pad)
        out_ref[...] = (logits + b_ref[...]).astype(out_ref.dtype)


def text_classification_forward(text, offsets, emb_table, fc_w, fc_b,
                                *, bag_tile=128, tok_tile=128):
    """EmbeddingBag(mode='mean') + Linear forward.

    text:      [T]   int   flat token ids (all bags concatenated)
    offsets:   [B]   int   bag start positions (sorted, offsets[0] == 0)
    emb_table: [V,D] f32   EmbeddingBag weight
    fc_w:      [D,C] f32   Linear weight (transposed vs PyTorch's [C,D])
    fc_b:      [C]   f32   Linear bias
    returns:   [B,C] f32
    """
    T = int(text.shape[0])
    B = int(offsets.shape[0])
    V, D = emb_table.shape
    C = fc_w.shape[1]

    TB = min(bag_tile, _round_up(B, 8))
    TT = tok_tile
    B_pad = _round_up(B, TB)
    T_pad = _round_up(T, TT)
    V_pad = _round_up(V, 128)
    D_pad = _round_up(D, 128)
    C_pad = _round_up(C, 128)

    # --- XLA-side prep: padding, per-token bag ids, inverse bag counts ---------
    text32 = text.astype(jnp.int32)
    offs32 = offsets.astype(jnp.int32)

    tokens_col = jnp.zeros((T_pad, 1), jnp.int32).at[:T, 0].set(text32)
    bag_of_tok = (jnp.searchsorted(offs32, jnp.arange(T, dtype=jnp.int32),
                                   side="right") - 1).astype(jnp.int32)
    bag_ids_row = jnp.full((1, T_pad), -1, jnp.int32).at[0, :T].set(bag_of_tok)

    offs_ext = jnp.concatenate([offs32, jnp.array([T], jnp.int32)])
    counts = (offs_ext[1:] - offs_ext[:-1]).astype(jnp.float32)      # [B]
    inv = 1.0 / jnp.maximum(counts, 1.0)                             # empty bag -> mean 0
    inv_col = jnp.zeros((B_pad, 1), jnp.float32).at[:B, 0].set(inv)

    emb_p = jnp.zeros((V_pad, D_pad), jnp.float32).at[:V, :D].set(
        emb_table.astype(jnp.float32))
    w_p = jnp.zeros((D_pad, C_pad), jnp.float32).at[:D, :C].set(
        fc_w.astype(jnp.float32))
    b_p = jnp.zeros((1, C_pad), jnp.float32).at[0, :C].set(fc_b.astype(jnp.float32))

    grid = (B_pad // TB, T_pad // TT)

    # TODO(synk): for very large vocabularies the full (V_pad, D_pad) table does not
    # fit VMEM (esp. v7x, 64 MiB); add a V-tile grid axis or keep the table in HBM
    # (memory_space=pl.ANY) and DMA-gather only the needed rows.
    grid_spec = pltpu.PrefetchScalarGridSpec(
        num_scalar_prefetch=0,
        grid=grid,
        in_specs=[
            pl.BlockSpec((TT, 1), lambda i, j: (j, 0)),          # tokens
            pl.BlockSpec((1, TT), lambda i, j: (0, j)),          # per-token bag ids
            pl.BlockSpec((TB, 1), lambda i, j: (i, 0)),          # 1/count per bag
            pl.BlockSpec((V_pad, D_pad), lambda i, j: (0, 0)),   # embedding table
            pl.BlockSpec((D_pad, C_pad), lambda i, j: (0, 0)),   # fc weight
            pl.BlockSpec((1, C_pad), lambda i, j: (0, 0)),       # fc bias
        ],
        out_specs=pl.BlockSpec((TB, C_pad), lambda i, j: (i, 0)),
        scratch_shapes=[pltpu.VMEM((TB, D_pad), jnp.float32)],
    )

    out_pad = pl.pallas_call(
        _textcls_kernel,
        out_shape=jax.ShapeDtypeStruct((B_pad, C_pad), jnp.float32),
        grid_spec=grid_spec,
        compiler_params=pltpu.CompilerParams(
            dimension_semantics=("parallel", "arbitrary")),
    )(tokens_col, bag_ids_row, inv_col, emb_p, w_p, b_p)

    return out_pad[:B, :C]


def reference_forward(text, offsets, emb_table, fc_w, fc_b):
    """Pure-JAX reference matching nn.EmbeddingBag(mode='mean') + nn.Linear."""
    T = text.shape[0]
    B = offsets.shape[0]
    offsets_ext = jnp.concatenate([offsets, jnp.array([T], dtype=offsets.dtype)])
    rows = []
    for b in range(B):
        s, e = int(offsets_ext[b]), int(offsets_ext[b + 1])
        if e > s:
            rows.append(emb_table[text[s:e]].mean(axis=0))
        else:
            rows.append(jnp.zeros(emb_table.shape[1], emb_table.dtype))
    bagged = jnp.stack(rows)                       # [B, D]
    return bagged @ fc_w + fc_b                    # [B, C]


if __name__ == "__main__":
    # Small, deterministic setup
    vocab_size, embed_dim, num_class = 50, 32, 8
    B, T = 4, 20
    initrange = 0.5

    key = jax.random.PRNGKey(0)
    k_emb, k_w, k_txt = jax.random.split(key, 3)

    # init_weights(): uniform(-0.5, 0.5) for embedding and fc weight, zero bias
    emb_table = jax.random.uniform(
        k_emb, (vocab_size, embed_dim), jnp.float32, -initrange, initrange
    )
    fc_w = jax.random.uniform(
        k_w, (embed_dim, num_class), jnp.float32, -initrange, initrange
    )  # stored as [D, C] (PyTorch stores [C, D]; this is its transpose)
    fc_b = jnp.zeros((num_class,), jnp.float32)

    text = jax.random.randint(k_txt, (T,), 0, vocab_size, dtype=jnp.int32)
    offsets = jnp.array([0, 5, 9, 15], dtype=jnp.int32)   # bag start positions

    out = text_classification_forward(text, offsets, emb_table, fc_w, fc_b)
    out = jax.block_until_ready(out)

    ref = reference_forward(text, offsets, emb_table, fc_w, fc_b)
    assert out.shape == (B, num_class), out.shape
    assert jnp.allclose(out, ref, atol=1e-5, rtol=1e-5), (out, ref)

    print("KERNEL_OK")
</pallas_src>

<mosaic_0001>
module attributes {stable_mosaic.version = 11 : i64} {
  func.func @_textcls_kernel(%arg0: i32, %arg1: i32, %arg2: memref<128x1xi32, #tpu.memory_space<vmem>>, %arg3: memref<1x128xi32, #tpu.memory_space<vmem>>, %arg4: memref<8x1xf32, #tpu.memory_space<vmem>>, %arg5: memref<128x128xf32, #tpu.memory_space<vmem>>, %arg6: memref<128x128xf32, #tpu.memory_space<vmem>>, %arg7: memref<1x128xf32, #tpu.memory_space<vmem>>, %arg8: memref<8x128xf32, #tpu.memory_space<vmem>>, %arg9: memref<8x128xf32, #tpu.memory_space<vmem>>) attributes {dimension_semantics = [#tpu.dimension_semantics<parallel>, #tpu.dimension_semantics<arbitrary>], iteration_bounds = array<i64: 1, 1>, scalar_prefetch = 0 : i64, scratch_operands = 1 : i64, tpu.core_type = #tpu.core_type<tc>, window_params = [{transform_indices = @transform_0, window_bounds = array<i64: 128, 1>}, {transform_indices = @transform_1, window_bounds = array<i64: 1, 128>}, {transform_indices = @transform_2, window_bounds = array<i64: 8, 1>}, {pipeline_mode = #tpu.pipeline_mode<synchronous>, transform_indices = @transform_3, window_bounds = array<i64: 128, 128>}, {pipeline_mode = #tpu.pipeline_mode<synchronous>, transform_indices = @transform_4, window_bounds = array<i64: 128, 128>}, {pipeline_mode = #tpu.pipeline_mode<synchronous>, transform_indices = @transform_5, window_bounds = array<i64: 1, 128>}, {transform_indices = @transform_6, window_bounds = array<i64: 8, 128>}]} {
    %c0_i32 = arith.constant 0 : i32
    %0 = arith.cmpi eq, %arg1, %c0_i32 : i32
    %1 = arith.extui %0 : i1 to i32
    %c0_i32_0 = arith.constant 0 : i32
    %2 = arith.cmpi ne, %1, %c0_i32_0 : i32
    scf.if %2 {
      %cst_13 = arith.constant 0.000000e+00 : f32
      %27 = vector.broadcast %cst_13 : f32 to vector<8x128xf32>
      %c0_14 = arith.constant 0 : index
      %c0_15 = arith.constant 0 : index
      %28 = vector.load %arg9[%c0_14, %c0_15] : memref<8x128xf32, #tpu.memory_space<vmem>>, vector<8x128xf32>
      tpu.vector_store %arg9[%c0_14, %c0_15], %27 {strides = array<i32>} : memref<8x128xf32, #tpu.memory_space<vmem>>, vector<8x128xf32>,
    } else {
    }
    %c0 = arith.constant 0 : index
    %c0_1 = arith.constant 0 : index
    %3 = vector.load %arg2[%c0, %c0_1] : memref<128x1xi32, #tpu.memory_space<vmem>>, vector<128x1xi32>
    %4 = tpu.iota {dimensions = array<i32: 1>} : vector<128x128xi32>
    %5 = vector.broadcast %3 : vector<128x1xi32> to vector<128x128xi32>
    %6 = arith.cmpi eq, %4, %5 : vector<128x128xi32>
    %7 = arith.extui %6 : vector<128x128xi1> to vector<128x128xi32>
    %8 = arith.sitofp %7 : vector<128x128xi32> to vector<128x128xf32>
    %c0_2 = arith.constant 0 : index
    %c0_3 = arith.constant 0 : index
    %9 = vector.load %arg5[%c0_2, %c0_3] : memref<128x128xf32, #tpu.memory_space<vmem>>, vector<128x128xf32>
    %cst = arith.constant dense<0.000000e+00> : vector<128x128xf32>
    %10 = tpu.matmul %8, %9, %cst {dimension_numbers = #tpu.dot_dimension_numbers<[1], [0], [0], [1], [0, 0, 1, 1], [], []>} : vector<128x128xf32>, vector<128x128xf32>, vector<128x128xf32> -> vector<128x128xf32>
    %c0_4 = arith.constant 0 : index
    %c0_5 = arith.constant 0 : index
    %11 = vector.load %arg3[%c0_4, %c0_5] : memref<1x128xi32, #tpu.memory_space<vmem>>, vector<1x128xi32>
    %12 = tpu.iota {dimensions = array<i32: 0>} : vector<8x128xi32>
    %c8_i32 = arith.constant 8 : i32
    %13 = arith.muli %arg0, %c8_i32 : i32
    %14 = vector.broadcast %13 : i32 to vector<8x128xi32>
    %15 = arith.addi %12, %14 : vector<8x128xi32>
    %16 = vector.broadcast %11 : vector<1x128xi32> to vector<8x128xi32>
    %17 = arith.cmpi eq, %16, %15 : vector<8x128xi32>
    %18 = arith.extui %17 : vector<8x128xi1> to vector<8x128xi32>
    %19 = arith.sitofp %18 : vector<8x128xi32> to vector<8x128xf32>
    %c0_6 = arith.constant 0 : index
    %c0_7 = arith.constant 0 : index
    %20 = vector.load %arg9[%c0_6, %c0_7] : memref<8x128xf32, #tpu.memory_space<vmem>>, vector<8x128xf32>
    %cst_8 = arith.constant dense<0.000000e+00> : vector<8x128xf32>
    %21 = tpu.matmul %19, %10, %cst_8 {dimension_numbers = #tpu.dot_dimension_numbers<[1], [0], [0], [1], [0, 0, 1, 1], [], []>} : vector<8x128xf32>, vector<128x128xf32>, vector<8x128xf32> -> vector<8x128xf32>
    %22 = arith.addf %20, %21 : vector<8x128xf32>
    %c0_9 = arith.constant 0 : index
    %c0_10 = arith.constant 0 : index
    %23 = vector.load %arg9[%c0_9, %c0_10] : memref<8x128xf32, #tpu.memory_space<vmem>>, vector<8x128xf32>
    tpu.vector_store %arg9[%c0_9, %c0_10], %22 {strides = array<i32>} : memref<8x128xf32, #tpu.memory_space<vmem>>, vector<8x128xf32>,
    %c0_i32_11 = arith.constant 0 : i32
    %24 = arith.cmpi eq, %arg1, %c0_i32_11 : i32
    %25 = arith.extui %24 : i1 to i32
    %c0_i32_12 = arith.constant 0 : i32
    %26 = arith.cmpi ne, %25, %c0_i32_12 : i32
    scf.if %26 {
      %c0_13 = arith.constant 0 : index
      %c0_14 = arith.constant 0 : index
      %27 = vector.load %arg9[%c0_13, %c0_14] : memref<8x128xf32, #tpu.memory_space<vmem>>, vector<8x128xf32>
      %c0_15 = arith.constant 0 : index
      %c0_16 = arith.constant 0 : index
      %28 = vector.load %arg4[%c0_15, %c0_16] : memref<8x1xf32, #tpu.memory_space<vmem>>, vector<8x1xf32>
      %29 = vector.broadcast %28 : vector<8x1xf32> to vector<8x128xf32>
      %30 = arith.mulf %27, %29 : vector<8x128xf32>
      %c0_17 = arith.constant 0 : index
      %c0_18 = arith.constant 0 : index
      %31 = vector.load %arg6[%c0_17, %c0_18] : memref<128x128xf32, #tpu.memory_space<vmem>>, vector<128x128xf32>
      %cst_19 = arith.constant dense<0.000000e+00> : vector<8x128xf32>
      %32 = tpu.matmul %30, %31, %cst_19 {dimension_numbers = #tpu.dot_dimension_numbers<[1], [0], [0], [1], [0, 0, 1, 1], [], []>} : vector<8x128xf32>, vector<128x128xf32>, vector<8x128xf32> -> vector<8x128xf32>
      %c0_20 = arith.constant 0 : index
      %c0_21 = arith.constant 0 : index
      %33 = vector.load %arg7[%c0_20, %c0_21] : memref<1x128xf32, #tpu.memory_space<vmem>>, vector<1x128xf32>
      %34 = vector.broadcast %33 : vector<1x128xf32> to vector<8x128xf32>
      %35 = arith.addf %32, %34 : vector<8x128xf32>
      %c0_22 = arith.constant 0 : index
      %c0_23 = arith.constant 0 : index
      %36 = vector.load %arg8[%c0_22, %c0_23] : memref<8x128xf32, #tpu.memory_space<vmem>>, vector<8x128xf32>
      tpu.vector_store %arg8[%c0_22, %c0_23], %35 {strides = array<i32>} : memref<8x128xf32, #tpu.memory_space<vmem>>, vector<8x128xf32>,
    } else {
    }
    return
  }
  func.func @transform_0(%arg0: i32, %arg1: i32) -> (i32, i32) {
    %c0_i32 = arith.constant 0 : i32
    %c0_i32_0 = arith.constant 0 : i32
    return %arg1, %c0_i32 : i32, i32
  }
  func.func @transform_1(%arg0: i32, %arg1: i32) -> (i32, i32) {
    %c0_i32 = arith.constant 0 : i32
    %c0_i32_0 = arith.constant 0 : i32
    return %c0_i32, %arg1 : i32, i32
  }
  func.func @transform_2(%arg0: i32, %arg1: i32) -> (i32, i32) {
    %c0_i32 = arith.constant 0 : i32
    %c0_i32_0 = arith.constant 0 : i32
    return %arg0, %c0_i32 : i32, i32
  }
  func.func @transform_3(%arg0: i32, %arg1: i32) -> (i32, i32) {
    %c0_i32 = arith.constant 0 : i32
    %c0_i32_0 = arith.constant 0 : i32
    %c0_i32_1 = arith.constant 0 : i32
    return %c0_i32, %c0_i32_0 : i32, i32
  }
  func.func @transform_4(%arg0: i32, %arg1: i32) -> (i32, i32) {
    %c0_i32 = arith.constant 0 : i32
    %c0_i32_0 = arith.constant 0 : i32
    %c0_i32_1 = arith.constant 0 : i32
    return %c0_i32, %c0_i32_0 : i32, i32
  }
  func.func @transform_5(%arg0: i32, %arg1: i32) -> (i32, i32) {
    %c0_i32 = arith.constant 0 : i32
    %c0_i32_0 = arith.constant 0 : i32
    %c0_i32_1 = arith.constant 0 : i32
    return %c0_i32, %c0_i32_0 : i32, i32
  }
  func.func @transform_6(%arg0: i32, %arg1: i32) -> (i32, i32) {
    %c0_i32 = arith.constant 0 : i32
    %c0_i32_0 = arith.constant 0 : i32
    return %arg0, %c0_i32 : i32, i32
  }
}

</mosaic_0001>

<bundles_post_ra>
// kernel: tpu_custom_call.1
= control target key start
LH: loop header
LB: loop body
LE: loop exit
PB: predicated region body
PF: predicated region fallthrough
CT: control target
= control target key end

     0   :  { %11 = vsyncpa [#allocation4], 0  ;;  %s1099_s0 = inlined_call_operand.vmem [shape: s32[128,1], index: 0, kind: input, shape index: {}]   ;;  %s1100_s1 = inlined_call_operand.vmem [shape: s32[1,128], index: 1, kind: input, shape index: {}]   ;;  %s1101_s2 = inlined_call_operand.vmem [shape: f32[8,1], index: 2, kind: input, shape index: {}]   ;;  %s1102_s3 = inlined_call_operand.vmem [shape: f32[128,128], index: 3, kind: input, shape index: {}]   ;;  %s1103_s4 = inlined_call_operand.hbm [shape: f32[128,128], index: 4, kind: input, shape index: {}]   ;;  %s1104_s5 = inlined_call_operand.vmem [shape: f32[1,128], index: 5, kind: input, shape index: {}]   ;;  %s1105_s6 = inlined_call_operand.hbm [shape: f32[8,128], index: 6, kind: output, shape index: {}]  }
   0x1   :  { %12 = vsyncpa [#allocation5], 0  ;;  %s891_s21 = smov [#allocation3]   ;;  %s843_s25 = scalar_lea.hbm %s1103_s4, 2048 }
   0x2   :  { %s26_s22 = sshll.u32 %s891_s21, 4  ;;  %p844_p0 = scmp.ne.s32.totalorder %s1103_s4, %s843_s25  ;;  %s27_s22 = int_to_ptr.vmem [resolvable:$true] %s26_s22 }
   0x3   :  { %p847_p1 = scmp.lt.u32.totalorder %s843_s25, %s1103_s4 }
   0x5   :  { %p849_p2 = pnand %p847_p1, %p844_p0 }
   0x7   :  { %852 = shalt.err (!%p849_p2)
}
   0x8   :  { %s853_s30 = scalar_lea.vmem %s27_s22, 2048  ;;  %p858_p4 = scmp.lt.s32.totalorder %s27_s22, %s27_s22 }
   0x9   :  { %p854_p3 = scmp.ne.s32.totalorder %s27_s22, %s853_s30  ;;  %p859_p5 = scmp.lt.s32.totalorder %s853_s30, %s853_s30 }
   0xb   :  { %p860_p6 = por %p859_p5, %p858_p4 }
   0xd   :  { %p861_p7 = pnand %p860_p6, %p854_p3 }
   0xf   :  { %864 = shalt.err (!%p861_p7)
}
  0x10   :  { %s892_s7 = smov 128   ;;  %s893_s8 = smov 8  }
  0x11   :  { %32 = dma.hbm_to_vmem [thread:$0]  %s1103_s4, 2048, %s27_s22, [#allocation4], %s892_s7, %s892_s7, %s893_s8  }
  0x12   :  { %887 = dma.done.wait [#allocation4], 2048  }
  0x13   :  { %888 = vsyncadd [#allocation4], 4294965248  ;;  %v894_v0 = vmov 0   ;;  %v45_v1 = vld [vmem:[%s1099_s0 + $0x10] sm:$0xff]  ;;  %v43_v2 = vld [vmem:[%s1099_s0] sm:$0xff]  ;;  %v59_v42 = vlaneseq  ;;  %v895_v46 = vmov 1.0  }
  0x14   :  { %842 = vset.pattern.permute.xlu1 %v894_v0  ;;  %841 = vset.pattern.permute.xlu0 %v894_v0  ;;  %v46_v3 = vld [vmem:[%s1099_s0 + $0x18] sm:$0xff]  ;;  %v44_v4 = vld [vmem:[%s1099_s0 + $0x8] sm:$0xff]  ;;  %v47_v6 = vld [vmem:[%s1099_s0 + $0x20] sm:$0xff]  ;;  %v896_v61 = vmov 0.0|0.0   ;;  %v898_v62 = vmov 0.0   ;;  %s899_s27 = smov [#allocation6]  }
  0x15   :  { %68 = vperm.xlu1 %842, %v45_v1   ;;  %62 = vperm.xlu0 %841, %v43_v2   ;;  %v48_v5 = vld [vmem:[%s1099_s0 + $0x28] sm:$0xff]  ;;  %v157_v7 = vld [vmem:[%s1102_s3] sm:$0xff]  ;;  %v159_v9 = vld [vmem:[%s1102_s3 + $0x10] sm:$0xff]  ;;  %v60_v43 = vand.u32 127, %v59_v42  ;;  %s515_s28 = sshll.u32 %s899_s27, 4  ;;  %s516_s28 = int_to_ptr.vmem [resolvable:$true] %s515_s28 }
  0x16   :  { %v158_v8 = vld [vmem:[%s1102_s3 + $0x8] sm:$0xff]  ;;  %v160_v10 = vld [vmem:[%s1102_s3 + $0x18] sm:$0xff]  ;;  %v161_v13 = vld [vmem:[%s1102_s3 + $0x20] sm:$0xff]  ;;  %784 = vmatprep.subr.bf16.mxu1 %v896_v61  ;;  %p870_p9 = scmp.lt.s32.totalorder %s516_s28, %s516_s28 }
  0x17   :  { %v752_v11 = vpack.c.bf16 %v158_v8, %v157_v7  ;;  %v756_v12 = vpack.c.bf16 %v160_v10, %v159_v9  ;;  %v162_v14 = vld [vmem:[%s1102_s3 + $0x28] sm:$0xff]  ;;  %v50_v15 = vld [vmem:[%s1099_s0 + $0x38] sm:$0xff]  ;;  %v49_v16 = vld [vmem:[%s1099_s0 + $0x30] sm:$0xff] }
  0x18   :  { %v760_v17 = vpack.c.bf16 %v162_v14, %v161_v13  ;;  %v163_v18 = vld [vmem:[%s1102_s3 + $0x30] sm:$0xff]  ;;  %v164_v19 = vld [vmem:[%s1102_s3 + $0x38] sm:$0xff]  ;;  %v52_v20 = vld [vmem:[%s1099_s0 + $0x48] sm:$0xff] }
  0x19   :  { %71 = vperm.xlu1 %842, %v46_v3   ;;  %65 = vperm.xlu0 %841, %v44_v4   ;;  %v51_v21 = vld [vmem:[%s1099_s0 + $0x40] sm:$0xff]  ;;  %v764_v22 = vpack.c.bf16 %v164_v19, %v163_v18  ;;  %v166_v24 = vld [vmem:[%s1102_s3 + $0x48] sm:$0xff]  ;;  %v54_v25 = vld [vmem:[%s1099_s0 + $0x58] sm:$0xff] }
  0x1a   :  { %753 = vmatprep.subr.bf16.mxu0 %v752_v11  ;;  %v165_v23 = vld [vmem:[%s1102_s3 + $0x40] sm:$0xff]  ;;  %v53_v26 = vld [vmem:[%s1099_s0 + $0x50] sm:$0xff]  ;;  %v168_v29 = vld [vmem:[%s1102_s3 + $0x58] sm:$0xff] }
  0x1b   :  { %755 = vmatpush3.bf16.msra.mxu0 %v752_v11  ;;  %v768_v27 = vpack.c.bf16 %v166_v24, %v165_v23  ;;  %v167_v28 = vld [vmem:[%s1102_s3 + $0x50] sm:$0xff]  ;;  %v56_v30 = vld [vmem:[%s1099_s0 + $0x68] sm:$0xff]  ;;  %v55_v31 = vld [vmem:[%s1099_s0 + $0x60] sm:$0xff] }
  0x1c   :  { %757 = vmatprep.subr.bf16.mxu0 %v756_v12  ;;  %v772_v32 = vpack.c.bf16 %v168_v29, %v167_v28  ;;  %v169_v33 = vld [vmem:[%s1102_s3 + $0x60] sm:$0xff]  ;;  %v170_v34 = vld [vmem:[%s1102_s3 + $0x68] sm:$0xff]  ;;  %v58_v35 = vld [vmem:[%s1099_s0 + $0x78] sm:$0xff] }
  0x1d   :  { %77 = vperm.xlu1 %842, %v48_v5   ;;  %74 = vperm.xlu0 %841, %v47_v6   ;;  %v57_v36 = vld [vmem:[%s1099_s0 + $0x70] sm:$0xff]  ;;  %v776_v37 = vpack.c.bf16 %v170_v34, %v169_v33  ;;  %v172_v39 = vld [vmem:[%s1102_s3 + $0x78] sm:$0xff]  ;;  %v408_v40 = vld [vmem:[%s1101_s2] sm:$0xff] }
  0x1e   :  { %v171_v38 = vld [vmem:[%s1102_s3 + $0x70] sm:$0xff]  ;;  %v415_v63 = vld [vmem:[#allocation3] sm:$0xff]  ;;  %v416_v0 = vld [vmem:[#allocation3 + $0x8] sm:$0xff] }
  0x1f   :  { %759 = vmatpush3.bf16.msra.mxu0 %v756_v12  ;;  %v780_v41 = vpack.c.bf16 %v172_v39, %v171_v38  ;;  %v417_v1 = vld [vmem:[#allocation3 + $0x10] sm:$0xff]  ;;  %v809_v2 = vpack.c.bf16 %v416_v0, %v415_v63  ;;  %v418_v3 = vld [vmem:[#allocation3 + $0x18] sm:$0xff]  ;;  %v419_v5 = vld [vmem:[#allocation3 + $0x20] sm:$0xff] }
  0x20   :  { %761 = vmatprep.subr.bf16.mxu0 %v760_v17  ;;  %v812_v4 = vpack.c.bf16 %v418_v3, %v417_v1  ;;  %v420_v6 = vld [vmem:[#allocation3 + $0x28] sm:$0xff]  ;;  %v421_v8 = vld [vmem:[#allocation3 + $0x30] sm:$0xff]  ;;  %v422_v9 = vld [vmem:[#allocation3 + $0x38] sm:$0xff] }
  0x21   :  { %83 = vperm.xlu1 %842, %v50_v15   ;;  %80 = vperm.xlu0 %841, %v49_v16   ;;  %v815_v7 = vpack.c.bf16 %v420_v6, %v419_v5  ;;  %v818_v10 = vpack.c.bf16 %v422_v9, %v421_v8  ;;  %v423_v11 = vld [vmem:[#allocation3 + $0x40] sm:$0xff]  ;;  %v424_v12 = vld [vmem:[#allocation3 + $0x48] sm:$0xff]  ;;  %v425_v14 = vld [vmem:[#allocation3 + $0x50] sm:$0xff] }
  0x22   :  { %v821_v13 = vpack.c.bf16 %v424_v12, %v423_v11  ;;  %v426_v15 = vld [vmem:[#allocation3 + $0x58] sm:$0xff]  ;;  %v428_v18 = vld [vmem:[#allocation3 + $0x68] sm:$0xff] }
  0x23   :  { %763 = vmatpush3.bf16.msra.mxu0 %v760_v17  ;;  %v824_v16 = vpack.c.bf16 %v426_v15, %v425_v14  ;;  %v427_v17 = vld [vmem:[#allocation3 + $0x60] sm:$0xff] }
  0x24   :  { %765 = vmatprep.subr.bf16.mxu0 %v764_v22  ;;  %v827_v19 = vpack.c.bf16 %v428_v18, %v427_v17 }
  0x25   :  { %89 = vperm.xlu1 %842, %v52_v20   ;;  %86 = vperm.xlu0 %841, %v51_v21   ;;  %v429_v20 = vld [vmem:[#allocation3 + $0x70] sm:$0xff]  ;;  %v430_v21 = vld [vmem:[#allocation3 + $0x78] sm:$0xff] }
  0x27   :  { %767 = vmatpush3.bf16.msra.mxu0 %v764_v22  ;;  %v830_v22 = vpack.c.bf16 %v430_v21, %v429_v20 }
  0x28   :  { %769 = vmatprep.subr.bf16.mxu0 %v768_v27 }
  0x29   :  { %95 = vperm.xlu1 %842, %v54_v25   ;;  %92 = vperm.xlu0 %841, %v53_v26  }
  0x2b   :  { %771 = vmatpush3.bf16.msra.mxu0 %v768_v27 }
  0x2c   :  { %773 = vmatprep.subr.bf16.mxu0 %v772_v32 }
  0x2d   :  { %101 = vperm.xlu1 %842, %v56_v30   ;;  %98 = vperm.xlu0 %841, %v55_v31  }
  0x2f   :  { %775 = vmatpush3.bf16.msra.mxu0 %v772_v32 }
  0x30   :  { %777 = vmatprep.subr.bf16.mxu0 %v776_v37 }
  0x31   :  { %107 = vperm.xlu1 %842, %v58_v35   ;;  %104 = vperm.xlu0 %841, %v57_v36  }
  0x33   :  { %779 = vmatpush3.bf16.msra.mxu0 %v776_v37 }
  0x34   :  { %781 = vmatprep.subr.bf16.mxu0 %v780_v41 }
  0x35   :  { %411 = vperm.xlu0 %841, %v408_v40  }
  0x37   :  { %783 = vmatpush3.bf16.msra.mxu0 %v780_v41 }
  0x38   :  { %808 = vmatprep.subr.bf16.mxu0 %v896_v61 }
  0x94   :  { %v69_v44 = vpop.permute.xlu1 %68  ;;  %v63_v45 = vpop.permute.xlu0 %62 }
  0x95   :  { %vm109_vm0 = vcmp.eq.s32.totalorder %v60_v43, %v63_v45  ;;  %vm111_vm1 = vcmp.eq.s32.totalorder %v60_v43, %v69_v44 }
  0x96   :  { %658 = vmatprep.mubr.msk.f32.mxu0 %vm109_vm0, %v895_v46  ;;  %vm897_vm0 = vmmov 0  }
  0x97   :  { %714 = vmatprep.mubr.msk.f32.mxu1 %vm897_vm0, %v898_v62 }
  0x98   :  { %v72_v47 = vpop.permute.xlu1 %71  ;;  %v66_v48 = vpop.permute.xlu0 %65 }
  0x99   :  { %vm110_vm2 = vcmp.eq.s32.totalorder %v60_v43, %v66_v48  ;;  %vm112_vm3 = vcmp.eq.s32.totalorder %v60_v43, %v72_v47  ;;  %v320_v47 = vshrl.u32 %v59_v42, 7  ;;  %v559_v42 = vld [vmem:[%s1104_s5] ss:$0 sm:$0xff] }
  0x9a   :  { %659 = vmatmul.mubr.msk.f32.vlgmr.msra.gmra.mrb[0].mxu0 %vm110_vm2, %v895_v46 }
  0x9b   :  { %661 = vmatprep.mubr.msk.f32.mxu0 %vm111_vm1, %v895_v46  ;;  %810 = vmatpush3.bf16.msra.mxu0 %v809_v2 }
  0x9c   :  { %v78_v49 = vpop.permute.xlu1 %77  ;;  %v75_v50 = vpop.permute.xlu0 %74  ;;  %811 = vmatprep.subr.bf16.mxu0 %v896_v61 }
  0x9d   :  { %vm113_vm4 = vcmp.eq.s32.totalorder %v60_v43, %v75_v50  ;;  %vm114_vm5 = vcmp.eq.s32.totalorder %v60_v43, %v78_v49  ;;  %v556_v49 = vld [vmem:[%s1100_s1] ss:$0 sm:$0xff]  ;;  %s865_s1 = scalar_lea.vmem %s516_s28, 128 }
  0x9e   :  { %662 = vmatmul.mubr.msk.f32.gmra.mrb[2].mxu0 %vm112_vm3, %v895_v46  ;;  %vm328_vm1 = vcmp.eq.s32.totalorder %v556_v49, %v320_v47  ;;  %p866_p8 = scmp.ne.s32.totalorder %s516_s28, %s865_s1  ;;  %p871_p10 = scmp.lt.s32.totalorder %s865_s1, %s865_s1 }
  0x9f   :  { %664 = vmatprep.mubr.msk.f32.mxu0 %vm113_vm4, %v895_v46  ;;  %813 = vmatpush3.bf16.msra.mxu0 %v812_v4 }
  0xa0   :  { %v84_v51 = vpop.permute.xlu1 %83  ;;  %v81_v52 = vpop.permute.xlu0 %80  ;;  %814 = vmatprep.subr.bf16.mxu0 %v896_v61  ;;  %p872_p11 = por %p871_p10, %p870_p9 }
  0xa1   :  { %vm115_vm6 = vcmp.eq.s32.totalorder %v60_v43, %v81_v52  ;;  %vm116_vm7 = vcmp.eq.s32.totalorder %v60_v43, %v84_v51 }
  0xa2   :  { %665 = vmatmul.mubr.msk.f32.gmra.mrb[4].mxu0 %vm114_vm5, %v895_v46  ;;  %p873_p12 = pnand %p872_p11, %p866_p8 }
  0xa3   :  { %667 = vmatprep.mubr.msk.f32.mxu0 %vm115_vm6, %v895_v46  ;;  %816 = vmatpush3.bf16.msra.mxu0 %v815_v7 }
  0xa4   :  { %v90_v53 = vpop.permute.xlu1 %89  ;;  %v87_v54 = vpop.permute.xlu0 %86  ;;  %817 = vmatprep.subr.bf16.mxu0 %v896_v61 }
  0xa5   :  { %vm117_vm8 = vcmp.eq.s32.totalorder %v60_v43, %v87_v54  ;;  %vm118_vm9 = vcmp.eq.s32.totalorder %v60_v43, %v90_v53 }
  0xa6   :  { %668 = vmatmul.mubr.msk.f32.gmra.mrb[6].mxu0 %vm116_vm7, %v895_v46 }
  0xa7   :  { %670 = vmatprep.mubr.msk.f32.mxu0 %vm117_vm8, %v895_v46  ;;  %819 = vmatpush3.bf16.msra.mxu0 %v818_v10 }
  0xa8   :  { %v96_v55 = vpop.permute.xlu1 %95  ;;  %v93_v56 = vpop.permute.xlu0 %92  ;;  %820 = vmatprep.subr.bf16.mxu0 %v896_v61 }
  0xa9   :  { %vm119_vm10 = vcmp.eq.s32.totalorder %v60_v43, %v93_v56  ;;  %vm120_vm11 = vcmp.eq.s32.totalorder %v60_v43, %v96_v55 }
  0xaa   :  { %671 = vmatmul.mubr.msk.f32.gmra.mrb[8].mxu0 %vm118_vm9, %v895_v46 }
  0xab   :  { %673 = vmatprep.mubr.msk.f32.mxu0 %vm119_vm10, %v895_v46  ;;  %822 = vmatpush3.bf16.msra.mxu0 %v821_v13 }
  0xac   :  { %v102_v57 = vpop.permute.xlu1 %101  ;;  %v99_v58 = vpop.permute.xlu0 %98  ;;  %823 = vmatprep.subr.bf16.mxu0 %v896_v61 }
  0xad   :  { %vm121_vm12 = vcmp.eq.s32.totalorder %v60_v43, %v99_v58  ;;  %vm122_vm13 = vcmp.eq.s32.totalorder %v60_v43, %v102_v57 }
  0xae   :  { %674 = vmatmul.mubr.msk.f32.gmra.mrb[10].mxu0 %vm120_vm11, %v895_v46 }
  0xaf   :  { %676 = vmatprep.mubr.msk.f32.mxu0 %vm121_vm12, %v895_v46  ;;  %825 = vmatpush3.bf16.msra.mxu0 %v824_v16 }
  0xb0   :  { %v105_v59 = vpop.permute.xlu0 %104  ;;  %v108_v60 = vpop.permute.xlu1 %107  ;;  %826 = vmatprep.subr.bf16.mxu0 %v896_v61 }
  0xb1   :  { %vm123_vm14 = vcmp.eq.s32.totalorder %v60_v43, %v105_v59  ;;  %vm124_vm15 = vcmp.eq.s32.totalorder %v60_v43, %v108_v60 }
  0xb2   :  { %677 = vmatmul.mubr.msk.f32.gmra.mrb[12].mxu0 %vm122_vm13, %v895_v46 }
  0xb3   :  { %679 = vmatprep.mubr.msk.f32.mxu0 %vm123_vm14, %v895_v46  ;;  %828 = vmatpush3.bf16.msra.mxu0 %v827_v19 }
  0xb4   :  { %829 = vmatprep.subr.bf16.mxu0 %v896_v61  ;;  %v412_v51 = vpop.permute.xlu0 %411 }
  0xb6   :  { %680 = vmatmul.mubr.msk.f32.gmra.mrb[14].mxu0 %vm124_vm15, %v895_v46 }
  0xb7   :  { %749 = vmatprep.mubr.msk.f32.mxu0 %vm897_vm0, %v898_v62  ;;  %831 = vmatpush3.bf16.msra.mxu0 %v830_v22 }
 0x16d   :  { %v660_v23 = vpop.f32.mrb[0].mxu0 }
 0x16e   :  { %v239_v24 = vpop.f32.mrb[1].mxu0 }
 0x16f   :  { %v785_v25 = vpack.c.bf16 %v660_v23, %v239_v24 }
 0x171   :  { %v663_v26 = vpop.f32.mrb[2].mxu0  ;;  %786 = vmatpush3.bf16.msra.mxu1 %v785_v25 }
 0x172   :  { %v249_v27 = vpop.f32.mrb[3].mxu0  ;;  %787 = vmatprep.subr.bf16.mxu1 %v896_v61 }
 0x173   :  { %v788_v28 = vpack.c.bf16 %v663_v26, %v249_v27 }
 0x175   :  { %v666_v29 = vpop.f32.mrb[4].mxu0  ;;  %789 = vmatpush3.bf16.msra.mxu1 %v788_v28 }
 0x176   :  { %v259_v30 = vpop.f32.mrb[5].mxu0  ;;  %790 = vmatprep.subr.bf16.mxu1 %v896_v61 }
 0x177   :  { %v791_v31 = vpack.c.bf16 %v666_v29, %v259_v30 }
 0x179   :  { %v669_v32 = vpop.f32.mrb[6].mxu0  ;;  %792 = vmatpush3.bf16.msra.mxu1 %v791_v31 }
 0x17a   :  { %v269_v33 = vpop.f32.mrb[7].mxu0  ;;  %793 = vmatprep.subr.bf16.mxu1 %v896_v61 }
 0x17b   :  { %v794_v34 = vpack.c.bf16 %v669_v32, %v269_v33 }
 0x17d   :  { %v672_v35 = vpop.f32.mrb[8].mxu0  ;;  %795 = vmatpush3.bf16.msra.mxu1 %v794_v34 }
 0x17e   :  { %v279_v36 = vpop.f32.mrb[9].mxu0  ;;  %796 = vmatprep.subr.bf16.mxu1 %v896_v61 }
 0x17f   :  { %v797_v37 = vpack.c.bf16 %v672_v35, %v279_v36 }
 0x181   :  { %v675_v38 = vpop.f32.mrb[10].mxu0  ;;  %798 = vmatpush3.bf16.msra.mxu1 %v797_v37 }
 0x182   :  { %v289_v39 = vpop.f32.mrb[11].mxu0  ;;  %799 = vmatprep.subr.bf16.mxu1 %v896_v61 }
 0x183   :  { %v800_v40 = vpack.c.bf16 %v675_v38, %v289_v39 }
 0x185   :  { %v678_v41 = vpop.f32.mrb[12].mxu0  ;;  %801 = vmatpush3.bf16.msra.mxu1 %v800_v40 }
 0x186   :  { %v299_v43 = vpop.f32.mrb[13].mxu0  ;;  %802 = vmatprep.subr.bf16.mxu1 %v896_v61 }
 0x187   :  { %v803_v44 = vpack.c.bf16 %v678_v41, %v299_v43 }
 0x189   :  { %v681_v45 = vpop.f32.mrb[14].mxu0  ;;  %804 = vmatpush3.bf16.msra.mxu1 %v803_v44 }
 0x18a   :  { %v309_v48 = vpop.f32.mrb[15].mxu0  ;;  %805 = vmatprep.subr.bf16.mxu1 %v896_v61 }
 0x18b   :  { %v806_v50 = vpack.c.bf16 %v681_v45, %v309_v48 }
 0x18d   :  { %807 = vmatpush3.bf16.msra.mxu1 %v806_v50 }
 0x190   :  { %715 = vmatmul.mubr.msk.f32.vlgmr.msra.gmra.mrb[0].mxu1 %vm328_vm1, %v895_v46 }
 0x263   :  { %v398_v52 = vpop.f32.mrb[0].mxu1 }
 0x264   :  { %v414_v53 = vmul.f32 %v412_v51, %v398_v52  ;;  %v716_v54 = vpop.f32.mrb[1].mxu1 }
 0x266   :  { %750 = vmatmul.mubr.f32.vlgmr.msra.gmra.mrb[16].mxu0 %v414_v53 }
 0x339   :  { %v504_v55 = vpop.f32.mrb[16].mxu0 }
 0x33a   :  { %v505_v56 = vadd.f32 %v559_v42, %v504_v55  ;;  %v751_v57 = vpop.f32.mrb[17].mxu0 }
 0x33c   :  { %508 = vst [vmem:[#allocation6] sm:$0xff] %v505_v56 }
 0x33d   :  { %876 = shalt.err (!%p873_p12)
}
 0x33e   :  { %s877_s7 = scalar_lea.hbm %s1105_s6, 128 }
 0x33f   :  { %p878_p13 = scmp.ne.s32.totalorder %s1105_s6, %s877_s7  ;;  %p881_p0 = scmp.lt.u32.totalorder %s877_s7, %s1105_s6 }
 0x341   :  { %p883_p1 = pnand %p881_p0, %p878_p13 }
 0x343   :  { %886 = shalt.err (!%p883_p1)
}
 0x344   :  { %518 = dma.vmem_to_hbm [thread:$0]  %s516_s28, 128, %s1105_s6, [#allocation5]  }
 0x345   :  { %889 = dma.done.wait [#allocation5], 128  }
 0x346   :  { %890 = vsyncadd [#allocation5], 4294967168 }
 0x347   :  { %522 = vsyncpa [#allocation4], 1 }
 0x348   :  { %523 = vsyncpa [#allocation5], 1 }

</bundles_post_ra>
